<compile_context>
chip_gen: v6e
topology: v6e:2x2x1
jax: 0.10.0
libtpu: 0.0.40
codegen_flags: <defaults>
</compile_context>

<pallas_src>
import functools

import jax
import jax.numpy as jnp
from jax.experimental import pallas as pl
from jax.experimental.pallas import tpu as pltpu

LANE = 128   # vreg lane width: output/hidden feature dims padded to this


def _round_up(x, m):
    return (x + m - 1) // m * m


def dmlp_kernel(x_ref, w1_ref, b1_ref, w2_ref, b2_ref, w3_ref, b3_ref, o_ref):
    """One batch tile of the 3-layer MLP, fully fused.

    Matmuls run on the MXU in bf16 with f32 accumulation; bias-add + ReLU run
    in f32 on the VPU (portable across v5e/v6e/v7x).
    """
    cd = w1_ref.dtype  # MXU operand (compute) dtype, bf16

    # layer 1: x @ W1 + b1 -> ReLU -> (dropout = identity in eval mode)
    x = x_ref[...].astype(cd)          # f32 tile -> bf16 MXU operand, in-VMEM
    h1 = jnp.dot(x, w1_ref[...], preferred_element_type=jnp.float32)
    h1 = jnp.maximum(h1 + b1_ref[...], 0.0)
    # TODO(synk): training-mode dropout mask via in-kernel PRNG would go here.

    # layer 2: h1 @ W2 + b2 -> ReLU -> (dropout = identity)
    h2 = jnp.dot(h1.astype(cd), w2_ref[...], preferred_element_type=jnp.float32)
    h2 = jnp.maximum(h2 + b2_ref[...], 0.0)

    # layer 3: h2 @ W3 + b3
    out = jnp.dot(h2.astype(cd), w3_ref[...], preferred_element_type=jnp.float32)
    o_ref[...] = (out + b3_ref[...]).astype(o_ref.dtype)


def prepare_params(params, compute_dtype=jnp.bfloat16):
    """One-time pad + cast of the DMLP parameters (do this at init, not per call).

    Weight output dims (hdim1/hdim2/odim) are zero-padded to the 128-lane
    width for lane-dense MXU passes and unmasked output stores. The first
    layer's K dim (ind) is left unpadded - Mosaic lane-pads it in-vreg.
    Returns (padded_param_dict, odim).
    """
    w1, b1 = params["w1"], params["b1"]
    w2, b2 = params["w2"], params["b2"]
    w3, b3 = params["w3"], params["b3"]
    ind, h1 = w1.shape
    h2 = w2.shape[1]
    od = w3.shape[1]
    h1_p, h2_p, od_p = (_round_up(d, LANE) for d in (h1, h2, od))

    def pad2(a, rows, cols, dtype):
        return jnp.pad(a, ((0, rows - a.shape[0]),
                           (0, cols - a.shape[1]))).astype(dtype)

    cd = compute_dtype
    padded = dict(
        w1=pad2(w1, ind, h1_p, cd),          # (ind, h1_p)   bf16, K unpadded
        b1=pad2(b1, 1, h1_p, jnp.float32),   # (1,   h1_p)   f32
        w2=pad2(w2, h1_p, h2_p, cd),         # (h1_p, h2_p)  bf16
        b2=pad2(b2, 1, h2_p, jnp.float32),   # (1,   h2_p)   f32
        w3=pad2(w3, h2_p, od_p, cd),         # (h2_p, od_p)  bf16
        b3=pad2(b3, 1, od_p, jnp.float32),   # (1,   od_p)   f32
    )
    return padded, od


@functools.partial(jax.jit, static_argnames=("odim", "block_b"))
def dmlp_forward(x, padded, *, odim, block_b=None):
    """x: [B, ind] float32. padded: output of prepare_params. Returns [B, odim] f32."""
    B, ind = x.shape
    assert padded["w1"].shape[0] == ind, "x feature dim does not match W1"
    h1_p = padded["w1"].shape[1]
    h2_p = padded["w2"].shape[1]
    od_p = padded["w3"].shape[1]

    # Batch tile: one tile for small batches (single-TC v5e/v6e want the fewest
    # grid steps); exactly two tiles for larger batches so the parallel batch
    # axis can shard across v7x's two TensorCores.
    if block_b is None:
        B_p = _round_up(B, 256)
        block_b = B_p if B_p <= 256 else B_p // 2
    else:
        B_p = _round_up(B, block_b)
    grid = (B_p // block_b,)

    # Only the batch is padded; x stays f32 and lane-unpadded (last block dim
    # == full array dim satisfies the (8,128) BlockSpec rule).
    x_p = jnp.pad(x, ((0, B_p - B), (0, 0)))

    flops = 2 * B_p * (ind * h1_p + h1_p * h2_p + h2_p * od_p)
    bytes_accessed = (x_p.size * x_p.dtype.itemsize
                      + sum(a.size * a.dtype.itemsize for a in padded.values())
                      + B_p * od_p * 4)

    out_p = pl.pallas_call(
        dmlp_kernel,
        out_shape=jax.ShapeDtypeStruct((B_p, od_p), jnp.float32),
        grid_spec=pltpu.PrefetchScalarGridSpec(
            num_scalar_prefetch=0,
            grid=grid,
            in_specs=[
                pl.BlockSpec((block_b, ind), lambda i: (i, 0)),  # x tile (pipelined)
                pl.BlockSpec((ind, h1_p), lambda i: (0, 0)),     # W1 (resident)
                pl.BlockSpec((1, h1_p), lambda i: (0, 0)),       # b1
                pl.BlockSpec((h1_p, h2_p), lambda i: (0, 0)),    # W2
                pl.BlockSpec((1, h2_p), lambda i: (0, 0)),       # b2
                pl.BlockSpec((h2_p, od_p), lambda i: (0, 0)),    # W3
                pl.BlockSpec((1, od_p), lambda i: (0, 0)),       # b3
            ],
            out_specs=pl.BlockSpec((block_b, od_p), lambda i: (i, 0)),
        ),
        compiler_params=pltpu.CompilerParams(
            dimension_semantics=("parallel",)),   # batch tiles -> megacore shardable
        cost_estimate=pl.CostEstimate(
            flops=flops, transcendentals=0, bytes_accessed=bytes_accessed),
    )(x_p, padded["w1"], padded["b1"], padded["w2"], padded["b2"],
      padded["w3"], padded["b3"])

    return out_p[:B, :odim]


def init_params(key, ind, hdim1, hdim2, odim):
    """Deterministic init mimicking nn.Linear (uniform +-1/sqrt(fan_in)).
    Weights are stored transposed: [in_features, out_features]."""
    ks = jax.random.split(key, 6)

    def linear(kw, kb, fan_in, fan_out):
        bound = 1.0 / jnp.sqrt(fan_in)
        w = jax.random.uniform(kw, (fan_in, fan_out), jnp.float32, -bound, bound)
        b = jax.random.uniform(kb, (1, fan_out), jnp.float32, -bound, bound)
        return w, b

    w1, b1 = linear(ks[0], ks[1], ind, hdim1)
    w2, b2 = linear(ks[2], ks[3], hdim1, hdim2)
    w3, b3 = linear(ks[4], ks[5], hdim2, odim)
    return dict(w1=w1, b1=b1, w2=w2, b2=b2, w3=w3, b3=b3)


def dmlp_ref(x, p, compute_dtype=jnp.bfloat16):
    """Pure-JAX reference using the same bf16-operand / f32-accumulate recipe."""
    cd = compute_dtype

    def dot(a, w):
        return jnp.dot(a.astype(cd), w.astype(cd),
                       preferred_element_type=jnp.float32)

    h1 = jnp.maximum(dot(x, p["w1"]) + p["b1"], 0.0)
    h2 = jnp.maximum(dot(h1, p["w2"]) + p["b2"], 0.0)
    return dot(h2, p["w3"]) + p["b3"]


if __name__ == "__main__":
    # DMLP(ind=32, hdim1=64, hdim2=64, odim=16, DP=0.1) in eval mode.
    # B=300 pads to 512 -> two 256-row tiles: exercises batch padding, the
    # pipelined grid, and v7x megacore sharding of the parallel axis.
    B, IND, H1, H2, ODIM = 300, 32, 64, 64, 16
    key = jax.random.PRNGKey(0)
    kx, kp = jax.random.split(key)
    x = jax.random.normal(kx, (B, IND), jnp.float32)
    params = init_params(kp, IND, H1, H2, ODIM)

    padded_params, odim = prepare_params(params)      # one-time pad + bf16 cast
    out = dmlp_forward(x, padded_params, odim=odim)
    out = jax.block_until_ready(out)
    assert out.shape == (B, ODIM)

    ref = dmlp_ref(x, params, compute_dtype=jnp.bfloat16)
    err = float(jnp.max(jnp.abs(out - ref)))
    assert jnp.allclose(out, ref, atol=1e-2, rtol=1e-2), f"max abs err {err}"
    print("KERNEL_OK")
</pallas_src>

<mosaic_0001>
module attributes {stable_mosaic.version = 11 : i64} {
  func.func @dmlp_kernel(%arg0: i32, %arg1: memref<256x32xf32, #tpu.memory_space<vmem>>, %arg2: memref<32x128xbf16, #tpu.memory_space<vmem>>, %arg3: memref<1x128xf32, #tpu.memory_space<vmem>>, %arg4: memref<128x128xbf16, #tpu.memory_space<vmem>>, %arg5: memref<1x128xf32, #tpu.memory_space<vmem>>, %arg6: memref<128x128xbf16, #tpu.memory_space<vmem>>, %arg7: memref<1x128xf32, #tpu.memory_space<vmem>>, %arg8: memref<256x128xf32, #tpu.memory_space<vmem>>) attributes {dimension_semantics = [#tpu.dimension_semantics<parallel>], iteration_bounds = array<i64: 2>, scalar_prefetch = 0 : i64, scratch_operands = 0 : i64, tpu.core_type = #tpu.core_type<tc>, window_params = [{transform_indices = @transform_0, window_bounds = array<i64: 256, 32>}, {pipeline_mode = #tpu.pipeline_mode<synchronous>, transform_indices = @transform_1, window_bounds = array<i64: 32, 128>}, {pipeline_mode = #tpu.pipeline_mode<synchronous>, transform_indices = @transform_2, window_bounds = array<i64: 1, 128>}, {pipeline_mode = #tpu.pipeline_mode<synchronous>, transform_indices = @transform_3, window_bounds = array<i64: 128, 128>}, {pipeline_mode = #tpu.pipeline_mode<synchronous>, transform_indices = @transform_4, window_bounds = array<i64: 1, 128>}, {pipeline_mode = #tpu.pipeline_mode<synchronous>, transform_indices = @transform_5, window_bounds = array<i64: 128, 128>}, {pipeline_mode = #tpu.pipeline_mode<synchronous>, transform_indices = @transform_6, window_bounds = array<i64: 1, 128>}, {transform_indices = @transform_7, window_bounds = array<i64: 256, 128>}]} {
    %c0 = arith.constant 0 : index
    %c0_0 = arith.constant 0 : index
    %0 = vector.load %arg1[%c0, %c0_0] : memref<256x32xf32, #tpu.memory_space<vmem>>, vector<256x32xf32>
    %1 = arith.truncf %0 : vector<256x32xf32> to vector<256x32xbf16>
    %c0_1 = arith.constant 0 : index
    %c0_2 = arith.constant 0 : index
    %2 = vector.load %arg2[%c0_1, %c0_2] : memref<32x128xbf16, #tpu.memory_space<vmem>>, vector<32x128xbf16>
    %cst = arith.constant dense<0.000000e+00> : vector<256x128xf32>
    %3 = tpu.matmul %1, %2, %cst {dimension_numbers = #tpu.dot_dimension_numbers<[1], [0], [0], [1], [0, 0, 1, 1], [], []>} : vector<256x32xbf16>, vector<32x128xbf16>, vector<256x128xf32> -> vector<256x128xf32>
    %c0_3 = arith.constant 0 : index
    %c0_4 = arith.constant 0 : index
    %4 = vector.load %arg3[%c0_3, %c0_4] : memref<1x128xf32, #tpu.memory_space<vmem>>, vector<1x128xf32>
    %5 = vector.broadcast %4 : vector<1x128xf32> to vector<256x128xf32>
    %6 = arith.addf %3, %5 : vector<256x128xf32>
    %cst_5 = arith.constant 0.000000e+00 : f32
    %7 = vector.broadcast %cst_5 : f32 to vector<256x128xf32>
    %8 = arith.maximumf %6, %7 : vector<256x128xf32>
    %9 = arith.truncf %8 : vector<256x128xf32> to vector<256x128xbf16>
    %c0_6 = arith.constant 0 : index
    %c0_7 = arith.constant 0 : index
    %10 = vector.load %arg4[%c0_6, %c0_7] : memref<128x128xbf16, #tpu.memory_space<vmem>>, vector<128x128xbf16>
    %cst_8 = arith.constant dense<0.000000e+00> : vector<256x128xf32>
    %11 = tpu.matmul %9, %10, %cst_8 {dimension_numbers = #tpu.dot_dimension_numbers<[1], [0], [0], [1], [0, 0, 1, 1], [], []>} : vector<256x128xbf16>, vector<128x128xbf16>, vector<256x128xf32> -> vector<256x128xf32>
    %c0_9 = arith.constant 0 : index
    %c0_10 = arith.constant 0 : index
    %12 = vector.load %arg5[%c0_9, %c0_10] : memref<1x128xf32, #tpu.memory_space<vmem>>, vector<1x128xf32>
    %13 = vector.broadcast %12 : vector<1x128xf32> to vector<256x128xf32>
    %14 = arith.addf %11, %13 : vector<256x128xf32>
    %cst_11 = arith.constant 0.000000e+00 : f32
    %15 = vector.broadcast %cst_11 : f32 to vector<256x128xf32>
    %16 = arith.maximumf %14, %15 : vector<256x128xf32>
    %17 = arith.truncf %16 : vector<256x128xf32> to vector<256x128xbf16>
    %c0_12 = arith.constant 0 : index
    %c0_13 = arith.constant 0 : index
    %18 = vector.load %arg6[%c0_12, %c0_13] : memref<128x128xbf16, #tpu.memory_space<vmem>>, vector<128x128xbf16>
    %cst_14 = arith.constant dense<0.000000e+00> : vector<256x128xf32>
    %19 = tpu.matmul %17, %18, %cst_14 {dimension_numbers = #tpu.dot_dimension_numbers<[1], [0], [0], [1], [0, 0, 1, 1], [], []>} : vector<256x128xbf16>, vector<128x128xbf16>, vector<256x128xf32> -> vector<256x128xf32>
    %c0_15 = arith.constant 0 : index
    %c0_16 = arith.constant 0 : index
    %20 = vector.load %arg7[%c0_15, %c0_16] : memref<1x128xf32, #tpu.memory_space<vmem>>, vector<1x128xf32>
    %21 = vector.broadcast %20 : vector<1x128xf32> to vector<256x128xf32>
    %22 = arith.addf %19, %21 : vector<256x128xf32>
    %c0_17 = arith.constant 0 : index
    %c0_18 = arith.constant 0 : index
    %23 = vector.load %arg8[%c0_17, %c0_18] : memref<256x128xf32, #tpu.memory_space<vmem>>, vector<256x128xf32>
    tpu.vector_store %arg8[%c0_17, %c0_18], %22 {strides = array<i32>} : memref<256x128xf32, #tpu.memory_space<vmem>>, vector<256x128xf32>,
    return
  }
  func.func @transform_0(%arg0: i32) -> (i32, i32) {
    %c0_i32 = arith.constant 0 : i32
    %c0_i32_0 = arith.constant 0 : i32
    return %arg0, %c0_i32 : i32, i32
  }
  func.func @transform_1(%arg0: i32) -> (i32, i32) {
    %c0_i32 = arith.constant 0 : i32
    %c0_i32_0 = arith.constant 0 : i32
    %c0_i32_1 = arith.constant 0 : i32
    return %c0_i32, %c0_i32_0 : i32, i32
  }
  func.func @transform_2(%arg0: i32) -> (i32, i32) {
    %c0_i32 = arith.constant 0 : i32
    %c0_i32_0 = arith.constant 0 : i32
    %c0_i32_1 = arith.constant 0 : i32
    return %c0_i32, %c0_i32_0 : i32, i32
  }
  func.func @transform_3(%arg0: i32) -> (i32, i32) {
    %c0_i32 = arith.constant 0 : i32
    %c0_i32_0 = arith.constant 0 : i32
    %c0_i32_1 = arith.constant 0 : i32
    return %c0_i32, %c0_i32_0 : i32, i32
  }
  func.func @transform_4(%arg0: i32) -> (i32, i32) {
    %c0_i32 = arith.constant 0 : i32
    %c0_i32_0 = arith.constant 0 : i32
    %c0_i32_1 = arith.constant 0 : i32
    return %c0_i32, %c0_i32_0 : i32, i32
  }
  func.func @transform_5(%arg0: i32) -> (i32, i32) {
    %c0_i32 = arith.constant 0 : i32
    %c0_i32_0 = arith.constant 0 : i32
    %c0_i32_1 = arith.constant 0 : i32
    return %c0_i32, %c0_i32_0 : i32, i32
  }
  func.func @transform_6(%arg0: i32) -> (i32, i32) {
    %c0_i32 = arith.constant 0 : i32
    %c0_i32_0 = arith.constant 0 : i32
    %c0_i32_1 = arith.constant 0 : i32
    return %c0_i32, %c0_i32_0 : i32, i32
  }
  func.func @transform_7(%arg0: i32) -> (i32, i32) {
    %c0_i32 = arith.constant 0 : i32
    %c0_i32_0 = arith.constant 0 : i32
    return %arg0, %c0_i32 : i32, i32
  }
}

</mosaic_0001>

<bundles_post_ra>
// kernel: dmlp_forward.1
= control target key start
LH: loop header
LB: loop body
LE: loop exit
PB: predicated region body
PF: predicated region fallthrough
CT: control target
= control target key end

     0   :  { %s1536_s24 = smov 0   ;;  %s1824_s0 = inlined_call_operand.vmem [shape: f32[512,32], index: 0, kind: input, shape index: {}]   ;;  %s1825_s1 = inlined_call_operand.vmem [shape: bf16[32,128], index: 1, kind: input, shape index: {}]   ;;  %s1826_s2 = inlined_call_operand.vmem [shape: f32[1,128], index: 2, kind: input, shape index: {}]   ;;  %s1827_s3 = inlined_call_operand.vmem [shape: bf16[128,128], index: 3, kind: input, shape index: {}]   ;;  %s1828_s4 = inlined_call_operand.vmem [shape: f32[1,128], index: 4, kind: input, shape index: {}]   ;;  %s1829_s5 = inlined_call_operand.vmem [shape: bf16[128,128], index: 5, kind: input, shape index: {}]   ;;  %s1830_s6 = inlined_call_operand.vmem [shape: f32[1,128], index: 6, kind: input, shape index: {}]   ;;  %s1831_s7 = inlined_call_operand.vmem [shape: f32[512,128], index: 7, kind: output, shape index: {}]  }
   0x1 LB: > { %s1212_s25 = sadd.s32 4294967295, %s1494_s24   ;;  %p1216_p0 = scmp.ge.s32.totalorder %s1494_s24, 1  ;;  %s1494_s24 = sphi %s1536_s24, %s17_s24  }
   0x2   : > { %p238_p1 = scmp.lt.s32.totalorder %s1494_s24, 3 }
   0x4   : > { %p239_p2 = pnand %p1216_p0, %p238_p1 }
   0x5   : > { %s1217_s28 = sshll.u32 (!%p239_p2), %s1212_s25, 5 }
   0x6   : > { %242 = sbr.rel (%p239_p2) target bundleno = 690 (0x2b2), region = 48  ;;  %p271_p3 = scmp.lt.s32.totalorder (!%p239_p2), %s1217_s28, 63 }
   0xb   : > { %v1470_v0 = vld [vmem:[%s1825_s1 + $0x8] sm:$0xff]   ;;  %v1471_v1 = vld [vmem:[%s1825_s1] sm:$0xff]   ;;  %s1833_s28 = smov (!%p271_p3, %s1217_s28), 63  ;;  %v1472_v2 = vld [vmem:[%s1827_s3 + $0x38] sm:$0xff]   ;;  %vm354_vm0 = vcmask 261120  }
   0xc   : > { %1326 = vmatprep.subr.bf16.mxu0 %v1470_v0  ;;  %1458 = vmatprep.subr.bf16.mxu1 %v1470_v0  ;;  %s1218_s10 = sshll.u32 %s1833_s28, 3  ;;  %v1473_v24 = vld [vmem:[%s1827_s3 + $0x30] sm:$0xff]   ;;  %v1474_v30 = vld [vmem:[%s1827_s3 + $0x28] sm:$0xff]   ;;  %v1475_v38 = vld [vmem:[%s1827_s3 + $0x20] sm:$0xff]  }
   0xd   : > { %1327 = vmatpush3.bf16.msra.mxu0 %v1470_v0  ;;  %1460 = vmatpush3.bf16.msra.mxu1 %v1470_v0  ;;  %s1561_s13 = scalar_lea.vmem %s1824_s0, %s1218_s10  ;;  %v1476_v46 = vld [vmem:[%s1827_s3 + $0x18] sm:$0xff]   ;;  %v1477_v55 = vld [vmem:[%s1827_s3 + $0x10] sm:$0xff]   ;;  %v1478_v56 = vld [vmem:[%s1827_s3 + $0x8] sm:$0xff]   ;;  %s1755_s12 = scalar_lea.vmem %s1831_s7, %s1218_s10 }
   0xe   : > { %1328 = vmatprep.subr.bf16.mxu0 %v1471_v1  ;;  %1459 = vmatprep.subr.bf16.mxu1 %v1471_v1  ;;  %v283_v3 = vld [vmem:[%s1561_s13] sm:$0xff]  ;;  %v284_v4 = vld [vmem:[%s1561_s13 + $0x8] sm:$0xff]  ;;  %v285_v5 = vld [vmem:[%s1561_s13 + $0x10] sm:$0xff] }
   0xf   : > { %v315_v6 = vpack.c.bf16 %v284_v4, %v283_v3  ;;  %v286_v7 = vld [vmem:[%s1561_s13 + $0x18] sm:$0xff]  ;;  %v287_v8 = vld [vmem:[%s1561_s13 + $0x20] sm:$0xff]  ;;  %v288_v9 = vld [vmem:[%s1561_s13 + $0x28] sm:$0xff] }
  0x10   : > { %v316_v10 = vpack.c.bf16 %v286_v7, %v285_v5  ;;  %v317_v11 = vpack.c.bf16 %v288_v9, %v287_v8  ;;  %v289_v12 = vld [vmem:[%s1561_s13 + $0x30] sm:$0xff]  ;;  %v290_v13 = vld [vmem:[%s1561_s13 + $0x38] sm:$0xff]  ;;  %v291_v14 = vld [vmem:[%s1561_s13 + $0x40] sm:$0xff] }
  0x11   : > { %1329 = vmatpush3.bf16.msra.mxu0 %v1471_v1  ;;  %1461 = vmatpush3.bf16.msra.mxu1 %v1471_v1  ;;  %v292_v15 = vld [vmem:[%s1561_s13 + $0x48] sm:$0xff]  ;;  %v299_v16 = vld [vmem:[%s1561_s13 + $0x80] sm:$0xff]  ;;  %v301_v19 = vld [vmem:[%s1561_s13 + $0x90] sm:$0xff]  ;;  %v318_v25 = vpack.c.bf16 %v290_v13, %v289_v12 }
  0x12   : > { %1362 = vmatprep.subr.bf16.mxu1 %v1472_v2  ;;  %1330 = vmatprep.mubr.msk.bf16.mxu0 %vm354_vm0, %v315_v6  ;;  %v300_v17 = vld [vmem:[%s1561_s13 + $0x88] sm:$0xff]  ;;  %v302_v20 = vld [vmem:[%s1561_s13 + $0x98] sm:$0xff]  ;;  %v303_v21 = vld [vmem:[%s1561_s13 + $0xa0] sm:$0xff]  ;;  %v319_v27 = vpack.c.bf16 %v292_v15, %v291_v14 }
  0x13   : > { %v323_v18 = vpack.c.bf16 %v300_v17, %v299_v16  ;;  %v324_v22 = vpack.c.bf16 %v302_v20, %v301_v19  ;;  %v304_v23 = vld [vmem:[%s1561_s13 + $0xa8] sm:$0xff]  ;;  %v305_v28 = vld [vmem:[%s1561_s13 + $0xb0] sm:$0xff]  ;;  %v306_v29 = vld [vmem:[%s1561_s13 + $0xb8] sm:$0xff] }
  0x14   : > { %1331 = vmatmul.mubr.msk.bf16.vlgmr.msra.gmra.mxu0 %vm354_vm0, %v316_v10  ;;  %v325_v26 = vpack.c.bf16 %v304_v23, %v303_v21  ;;  %v307_v31 = vld [vmem:[%s1561_s13 + $0xc0] sm:$0xff]  ;;  %v308_v32 = vld [vmem:[%s1561_s13 + $0xc8] sm:$0xff]  ;;  %v293_v33 = vld [vmem:[%s1561_s13 + $0x50] sm:$0xff]  ;;  %v326_v37 = vpack.c.bf16 %v306_v29, %v305_v28 }
  0x15   : > { %1334 = vmatprep.mubr.msk.bf16.mxu0 %vm354_vm0, %v317_v11  ;;  %1346 = vmatprep.mubr.msk.bf16.mxu1 %vm354_vm0, %v323_v18  ;;  %v294_v34 = vld [vmem:[%s1561_s13 + $0x58] sm:$0xff]  ;;  %v295_v35 = vld [vmem:[%s1561_s13 + $0x60] sm:$0xff]  ;;  %v296_v36 = vld [vmem:[%s1561_s13 + $0x68] sm:$0xff]  ;;  %v327_v39 = vpack.c.bf16 %v308_v32, %v307_v31 }
  0x16   : > { %1347 = vmatmul.mubr.msk.bf16.vlgmr.msra.gmra.mxu1 %vm354_vm0, %v324_v22  ;;  %v320_v40 = vpack.c.bf16 %v294_v34, %v293_v33  ;;  %v321_v41 = vpack.c.bf16 %v296_v36, %v295_v35  ;;  %v309_v42 = vld [vmem:[%s1561_s13 + $0xd0] sm:$0xff]  ;;  %v310_v43 = vld [vmem:[%s1561_s13 + $0xd8] sm:$0xff]  ;;  %v311_v44 = vld [vmem:[%s1561_s13 + $0xe0] sm:$0xff] }
  0x17   : > { %1350 = vmatprep.mubr.msk.bf16.mxu1 %vm354_vm0, %v325_v26  ;;  %1363 = vmatpush3.bf16.msra.mxu1 %v1472_v2  ;;  %v312_v45 = vld [vmem:[%s1561_s13 + $0xe8] sm:$0xff]  ;;  %v297_v47 = vld [vmem:[%s1561_s13 + $0x70] sm:$0xff]  ;;  %v298_v48 = vld [vmem:[%s1561_s13 + $0x78] sm:$0xff]  ;;  %v328_v49 = vpack.c.bf16 %v310_v43, %v309_v42 }
  0x18   : > { %1364 = vmatprep.subr.bf16.mxu1 %v1473_v24  ;;  %v329_v50 = vpack.c.bf16 %v312_v45, %v311_v44  ;;  %v322_v51 = vpack.c.bf16 %v298_v48, %v297_v47  ;;  %v313_v52 = vld [vmem:[%s1561_s13 + $0xf0] sm:$0xff]  ;;  %v314_v53 = vld [vmem:[%s1561_s13 + $0xf8] sm:$0xff]  ;;  %v1479_v57 = vld [vmem:[%s1827_s3] sm:$0xff]  }
  0x19   : > { %v330_v54 = vpack.c.bf16 %v314_v53, %v313_v52  ;;  %v1480_v58 = vld [vmem:[%s1829_s5 + $0x38] sm:$0xff]   ;;  %v1481_v59 = vld [vmem:[%s1829_s5 + $0x30] sm:$0xff]   ;;  %v1482_v60 = vld [vmem:[%s1829_s5 + $0x28] sm:$0xff]  }
  0x1a   : > { %1410 = vmatprep.subr.bf16.mxu0 %v1480_v58  ;;  %v1483_v61 = vld [vmem:[%s1829_s5 + $0x20] sm:$0xff]   ;;  %v1484_v62 = vld [vmem:[%s1829_s5 + $0x18] sm:$0xff]  }
  0x1b   : > { %1365 = vmatpush3.bf16.msra.mxu1 %v1473_v24  ;;  %1411 = vmatpush3.bf16.msra.mxu0 %v1480_v58  ;;  %v1650_v1 = vld [vmem:[%s1826_s2] ss:$0 sm:$0xff] }
  0x1c   : > { %1335 = vmatmul.mubr.msk.bf16.gmra.mxu0 %vm354_vm0, %v318_v25  ;;  %1366 = vmatprep.subr.bf16.mxu1 %v1474_v30 }
  0x1d   : > { %1338 = vmatprep.mubr.msk.bf16.mxu0 %vm354_vm0, %v319_v27  ;;  %1412 = vmatprep.subr.bf16.mxu0 %v1481_v59 }
  0x1e   : > { %1351 = vmatmul.mubr.msk.bf16.gmra.mxu1 %vm354_vm0, %v326_v37 }
  0x1f   : > { %1354 = vmatprep.mubr.msk.bf16.mxu1 %vm354_vm0, %v327_v39  ;;  %1367 = vmatpush3.bf16.msra.mxu1 %v1474_v30 }
  0x20   : > { %1368 = vmatprep.subr.bf16.mxu1 %v1475_v38  ;;  %1413 = vmatpush3.bf16.msra.mxu0 %v1481_v59 }
  0x21   : > { %1414 = vmatprep.subr.bf16.mxu0 %v1482_v60 }
  0x23   : > { %1369 = vmatpush3.bf16.msra.mxu1 %v1475_v38 }
  0x24   : > { %1339 = vmatmul.mubr.msk.bf16.gmra.mxu0 %vm354_vm0, %v320_v40  ;;  %1370 = vmatprep.subr.bf16.mxu1 %v1476_v46 }
  0x25   : > { %1342 = vmatprep.mubr.msk.bf16.mxu0 %vm354_vm0, %v321_v41  ;;  %1415 = vmatpush3.bf16.msra.mxu0 %v1482_v60 }
  0x26   : > { %1355 = vmatmul.mubr.msk.bf16.gmra.mxu1 %vm354_vm0, %v328_v49  ;;  %1416 = vmatprep.subr.bf16.mxu0 %v1483_v61 }
  0x27   : > { %1358 = vmatprep.mubr.msk.bf16.mxu1 %vm354_vm0, %v329_v50  ;;  %1371 = vmatpush3.bf16.msra.mxu1 %v1476_v46 }
  0x28   : > { %1372 = vmatprep.subr.bf16.mxu1 %v1477_v55 }
  0x29   : > { %1417 = vmatpush3.bf16.msra.mxu0 %v1483_v61 }
  0x2a   : > { %1418 = vmatprep.subr.bf16.mxu0 %v1484_v62 }
  0x2b   : > { %1373 = vmatpush3.bf16.msra.mxu1 %v1477_v55 }
  0x2c   : > { %1343 = vmatmul.mubr.msk.bf16.gmra.mxu0 %vm354_vm0, %v322_v51  ;;  %1374 = vmatprep.subr.bf16.mxu1 %v1478_v56 }
  0x2d   : > { %1419 = vmatpush3.bf16.msra.mxu0 %v1484_v62 }
  0x2e   : > { %1359 = vmatmul.mubr.msk.bf16.gmra.mxu1 %vm354_vm0, %v330_v54 }
  0x2f   : > { %1375 = vmatpush3.bf16.msra.mxu1 %v1478_v56 }
  0x30   : > { %1376 = vmatprep.subr.bf16.mxu1 %v1479_v57 }
  0x33   : > { %1377 = vmatpush3.bf16.msra.mxu1 %v1479_v57 }
  0xd4   : > { %v1332_v63 = vpop.f32.mrf.mxu0 }
  0xd5   : > { %v446_v6 = vadd.f32 %v1332_v63, %v1650_v1 }
  0xd6   : > { %v437_v0 = vpop.f32.mrf.mxu0  ;;  %v1654_v5 = vpop.f32.mrf.mxu1 }
  0xd7   : > { %v438_v3 = vadd.f32 %v1650_v1, %v437_v0  ;;  %v566_v15 = vmax.f32 %v446_v6, 0.0 }
  0xd8   : > { %v1333_v2 = vpop.f32.mrf.mxu0  ;;  %v501_v9 = vpop.f32.mrf.mxu1 }
  0xd9   : > { %v449_v4 = vadd.f32 %v1333_v2, %v1650_v1  ;;  %v564_v12 = vmax.f32 %v438_v3, 0.0  ;;  %v502_v53 = vadd.f32 %v1650_v1, %v501_v9 }
  0xda   : > { %v440_v7 = vpop.f32.mrf.mxu0  ;;  %v1658_v14 = vpop.f32.mrf.mxu1 }
  0xdb   : > { %v441_v8 = vadd.f32 %v1650_v1, %v440_v7  ;;  %v567_v10 = vmax.f32 %v449_v4, 0.0  ;;  %v580_v62 = vmax.f32 %v502_v53, 0.0  ;;  %v1711_v53 = vld [vmem:[%s1828_s4] ss:$0 sm:$0xff] }
  0xdc   : > { %v1336_v11 = vpop.f32.mrf.mxu0  ;;  %v504_v18 = vpop.f32.mrf.mxu1 }
  0xdd   : > { %v565_v13 = vmax.f32 %v441_v8, 0.0  ;;  %v597_v19 = vpack.c.bf16 %v567_v10, %v566_v15  ;;  %v462_v24 = vadd.f32 %v1336_v11, %v1650_v1  ;;  %v505_v54 = vadd.f32 %v1650_v1, %v504_v18 }
  0xde   : > { %v453_v16 = vpop.f32.mrf.mxu0  ;;  %v1662_v23 = vpop.f32.mrf.mxu1  ;;  %v513_v15 = vadd.f32 %v1658_v14, %v1650_v1 }
  0xdf   : > { %v596_v17 = vpack.c.bf16 %v565_v13, %v564_v12  ;;  %v454_v21 = vadd.f32 %v1650_v1, %v453_v16  ;;  %v570_v33 = vmax.f32 %v462_v24, 0.0  ;;  %v581_v0 = vmax.f32 %v505_v54, 0.0 }
  0xe0   : > { %v1337_v20 = vpop.f32.mrf.mxu0  ;;  %v517_v27 = vpop.f32.mrf.mxu1  ;;  %v510_v12 = vadd.f32 %v1654_v5, %v1650_v1  ;;  %v526_v5 = vadd.f32 %v1662_v23, %v1650_v1 }
  0xe1   : > { %v465_v22 = vadd.f32 %v1337_v20, %v1650_v1  ;;  %1378 = vmatprep.mubr.bf16.mxu1 %v596_v17  ;;  %v568_v30 = vmax.f32 %v454_v21, 0.0  ;;  %v604_v9 = vpack.c.bf16 %v581_v0, %v580_v62  ;;  %v518_v10 = vadd.f32 %v1650_v1, %v517_v27 }
  0xe2   : > { %v456_v25 = vpop.f32.mrf.mxu0  ;;  %1379 = vmatmul.mubr.bf16.vlgmr.msra.gmra.mxu1 %v597_v19  ;;  %v1666_v32 = vpop.f32.mrf.mxu1  ;;  %v582_v19 = vmax.f32 %v510_v12, 0.0  ;;  %v583_v20 = vmax.f32 %v513_v15, 0.0 }
  0xe3   : > { %v457_v26 = vadd.f32 %v1650_v1, %v456_v25  ;;  %v571_v28 = vmax.f32 %v465_v22, 0.0  ;;  %v584_v17 = vmax.f32 %v518_v10, 0.0  ;;  %v529_v14 = vadd.f32 %v1666_v32, %v1650_v1 }
  0xe4   : > { %v1340_v29 = vpop.f32.mrf.mxu0  ;;  %v520_v36 = vpop.f32.mrf.mxu1 }
  0xe5   : > { %v569_v31 = vmax.f32 %v457_v26, 0.0  ;;  %v599_v37 = vpack.c.bf16 %v571_v28, %v570_v33  ;;  %v478_v42 = vadd.f32 %v1340_v29, %v1650_v1  ;;  %v521_v11 = vadd.f32 %v1650_v1, %v520_v36 }
  0xe6   : > { %v469_v34 = vpop.f32.mrf.mxu0  ;;  %v1670_v41 = vpop.f32.mrf.mxu1  ;;  %v605_v26 = vpack.c.bf16 %v583_v20, %v582_v19 }
  0xe7   : > { %v598_v35 = vpack.c.bf16 %v569_v31, %v568_v30  ;;  %v470_v39 = vadd.f32 %v1650_v1, %v469_v34  ;;  %v574_v50 = vmax.f32 %v478_v42, 0.0  ;;  %v585_v18 = vmax.f32 %v521_v11, 0.0 }
  0xe8   : > { %v1341_v38 = vpop.f32.mrf.mxu0  ;;  %v533_v47 = vpop.f32.mrf.mxu1  ;;  %v586_v30 = vmax.f32 %v526_v5, 0.0  ;;  %v587_v31 = vmax.f32 %v529_v14, 0.0  ;;  %v542_v23 = vadd.f32 %v1670_v41, %v1650_v1  ;;  %v1485_v41 = vld [vmem:[%s1829_s5 + $0x10] sm:$0xff]  }
  0xe9   : > { %v481_v40 = vadd.f32 %v1341_v38, %v1650_v1  ;;  %1382 = vmatprep.mubr.bf16.mxu1 %v598_v35  ;;  %v572_v48 = vmax.f32 %v470_v39, 0.0  ;;  %v606_v22 = vpack.c.bf16 %v585_v18, %v584_v17  ;;  %v534_v24 = vadd.f32 %v1650_v1, %v533_v47  ;;  %1420 = vmatprep.subr.bf16.mxu0 %v1485_v41 }
  0xea   : > { %v472_v43 = vpop.f32.mrf.mxu0  ;;  %1383 = vmatmul.mubr.bf16.gmra.mxu1 %v599_v37  ;;  %v1357_v57 = vpop.f32.mrf.mxu1  ;;  %v607_v37 = vpack.c.bf16 %v587_v31, %v586_v30  ;;  %1421 = vmatpush3.bf16.msra.mxu0 %v1485_v41 }
  0xeb   : > { %v473_v44 = vadd.f32 %v1650_v1, %v472_v43  ;;  %v575_v45 = vmax.f32 %v481_v40, 0.0  ;;  %v588_v28 = vmax.f32 %v534_v24, 0.0  ;;  %v545_v38 = vadd.f32 %v1357_v57, %v1650_v1 }
  0xec   : > { %v1344_v46 = vpop.f32.mrf.mxu0  ;;  %v536_v3 = vpop.f32.mrf.mxu1  ;;  %v590_v40 = vmax.f32 %v542_v23, 0.0 }
  0xed   : > { %v573_v49 = vmax.f32 %v473_v44, 0.0  ;;  %v601_v55 = vpack.c.bf16 %v575_v45, %v574_v50  ;;  %v494_v60 = vadd.f32 %v1344_v46, %v1650_v1  ;;  %v537_v25 = vadd.f32 %v1650_v1, %v536_v3  ;;  %v1486_v50 = vld [vmem:[%s1829_s5 + $0x8] sm:$0xff]  }
  0xee   : > { %v485_v51 = vpop.f32.mrf.mxu0  ;;  %v1360_v16 = vpop.f32.mrf.mxu1  ;;  %v591_v42 = vmax.f32 %v545_v38, 0.0  ;;  %1422 = vmatprep.subr.bf16.mxu0 %v1486_v50 }
  0xef   : > { %v600_v52 = vpack.c.bf16 %v573_v49, %v572_v48  ;;  %v486_v58 = vadd.f32 %v1650_v1, %v485_v51  ;;  %v578_v7 = vmax.f32 %v494_v60, 0.0  ;;  %v589_v29 = vmax.f32 %v537_v25, 0.0  ;;  %1423 = vmatpush3.bf16.msra.mxu0 %v1486_v50 }
  0xf0   : > { %v1345_v56 = vpop.f32.mrf.mxu0  ;;  %v549_v21 = vpop.f32.mrf.mxu1  ;;  %v609_v44 = vpack.c.bf16 %v591_v42, %v590_v40  ;;  %v558_v45 = vadd.f32 %v1360_v16, %v1650_v1 }
  0xf1   : > { %v497_v59 = vadd.f32 %v1345_v56, %v1650_v1  ;;  %1386 = vmatprep.mubr.bf16.mxu1 %v600_v52  ;;  %v576_v4 = vmax.f32 %v486_v58, 0.0  ;;  %v608_v34 = vpack.c.bf16 %v589_v29, %v588_v28  ;;  %v550_v35 = vadd.f32 %v1650_v1, %v549_v21 }
  0xf2   : > { %v488_v61 = vpop.f32.mrf.mxu0  ;;  %1387 = vmatmul.mubr.bf16.gmra.mxu1 %v601_v55  ;;  %v1361_v27 = vpop.f32.mrf.mxu1  ;;  %v594_v47 = vmax.f32 %v558_v45, 0.0 }
  0xf3   : > { %v489_v63 = vadd.f32 %v1650_v1, %v488_v61  ;;  %v579_v2 = vmax.f32 %v497_v59, 0.0  ;;  %v592_v32 = vmax.f32 %v550_v35, 0.0  ;;  %v561_v46 = vadd.f32 %v1361_v27, %v1650_v1 }
  0xf4   : > { %v552_v33 = vpop.f32.mrf.mxu1 }
  0xf5   : > { %v577_v6 = vmax.f32 %v489_v63, 0.0  ;;  %v603_v13 = vpack.c.bf16 %v579_v2, %v578_v7  ;;  %v553_v36 = vadd.f32 %v1650_v1, %v552_v33  ;;  %v595_v48 = vmax.f32 %v561_v46, 0.0  ;;  %v1487_v1 = vld [vmem:[%s1829_s5] sm:$0xff]  }
  0xf6   : > { %1424 = vmatprep.subr.bf16.mxu0 %v1487_v1 }
  0xf7   : > { %v602_v8 = vpack.c.bf16 %v577_v6, %v576_v4  ;;  %v593_v39 = vmax.f32 %v553_v36, 0.0  ;;  %v611_v49 = vpack.c.bf16 %v595_v48, %v594_v47  ;;  %1425 = vmatpush3.bf16.msra.mxu0 %v1487_v1 }
  0xf9   : > { %1390 = vmatprep.mubr.bf16.mxu1 %v602_v8  ;;  %v610_v43 = vpack.c.bf16 %v593_v39, %v592_v32 }
  0xfa   : > { %1391 = vmatmul.mubr.bf16.gmra.mxu1 %v603_v13 }
  0xfb   : > { %1394 = vmatprep.mubr.bf16.mxu1 %v604_v9 }
 0x102   : > { %1395 = vmatmul.mubr.bf16.gmra.mxu1 %v605_v26 }
 0x103   : > { %1398 = vmatprep.mubr.bf16.mxu1 %v606_v22 }
 0x10a   : > { %1399 = vmatmul.mubr.bf16.gmra.mxu1 %v607_v37 }
 0x10b   : > { %1402 = vmatprep.mubr.bf16.mxu1 %v608_v34 }
 0x112   : > { %1403 = vmatmul.mubr.bf16.gmra.mxu1 %v609_v44 }
 0x113   : > { %1406 = vmatprep.mubr.bf16.mxu1 %v610_v43 }
 0x11a   : > { %1407 = vmatmul.mubr.bf16.gmra.mxu1 %v611_v49 }
 0x1a2   : > { %v1380_v51 = vpop.f32.mrf.mxu1 }
 0x1a3   : > { %v726_v57 = vadd.f32 %v1380_v51, %v1711_v53 }
 0x1a4   : > { %v717_v52 = vpop.f32.mrf.mxu1 }
 0x1a5   : > { %v718_v55 = vadd.f32 %v1711_v53, %v717_v52  ;;  %v846_v0 = vmax.f32 %v726_v57, 0.0 }
 0x1a6   : > { %v1381_v54 = vpop.f32.mrf.mxu1 }
 0x1a7   : > { %v729_v56 = vadd.f32 %v1381_v54, %v1711_v53  ;;  %v844_v62 = vmax.f32 %v718_v55, 0.0 }
 0x1a8   : > { %v720_v58 = vpop.f32.mrf.mxu1 }
 0x1a9   : > { %v721_v59 = vadd.f32 %v1711_v53, %v720_v58  ;;  %v847_v60 = vmax.f32 %v729_v56, 0.0 }
 0x1aa   : > { %v1384_v61 = vpop.f32.mrf.mxu1 }
 0x1ab   : > { %v845_v63 = vmax.f32 %v721_v59, 0.0  ;;  %v877_v4 = vpack.c.bf16 %v847_v60, %v846_v0  ;;  %v742_v9 = vadd.f32 %v1384_v61, %v1711_v53 }
 0x1ac   : > { %v733_v2 = vpop.f32.mrf.mxu1 }
 0x1ad   : > { %v876_v3 = vpack.c.bf16 %v845_v63, %v844_v62  ;;  %v734_v7 = vadd.f32 %v1711_v53, %v733_v2  ;;  %v850_v17 = vmax.f32 %v742_v9, 0.0 }
 0x1ae   : > { %v1385_v6 = vpop.f32.mrf.mxu1 }
 0x1af   : > { %v745_v8 = vadd.f32 %v1385_v6, %v1711_v53  ;;  %1426 = vmatprep.mubr.bf16.mxu0 %v876_v3  ;;  %v848_v15 = vmax.f32 %v734_v7, 0.0 }
 0x1b0   : > { %v736_v10 = vpop.f32.mrf.mxu1  ;;  %1427 = vmatmul.mubr.bf16.vlgmr.msra.gmra.mxu0 %v877_v4 }
 0x1b1   : > { %v737_v11 = vadd.f32 %v1711_v53, %v736_v10  ;;  %v851_v12 = vmax.f32 %v745_v8, 0.0 }
 0x1b2   : > { %v1388_v13 = vpop.f32.mrf.mxu1 }
 0x1b3   : > { %v849_v16 = vmax.f32 %v737_v11, 0.0  ;;  %v879_v20 = vpack.c.bf16 %v851_v12, %v850_v17  ;;  %v758_v25 = vadd.f32 %v1388_v13, %v1711_v53 }
 0x1b4   : > { %v749_v18 = vpop.f32.mrf.mxu1 }
 0x1b5   : > { %v878_v19 = vpack.c.bf16 %v849_v16, %v848_v15  ;;  %v750_v22 = vadd.f32 %v1711_v53, %v749_v18  ;;  %v854_v30 = vmax.f32 %v758_v25, 0.0 }
 0x1b6   : > { %v1389_v21 = vpop.f32.mrf.mxu1 }
 0x1b7   : > { %v761_v24 = vadd.f32 %v1389_v21, %v1711_v53  ;;  %1430 = vmatprep.mubr.bf16.mxu0 %v878_v19  ;;  %v852_v28 = vmax.f32 %v750_v22, 0.0 }
 0x1b8   : > { %v752_v26 = vpop.f32.mrf.mxu1  ;;  %1431 = vmatmul.mubr.bf16.gmra.mxu0 %v879_v20 }
 0x1b9   : > { %v753_v5 = vadd.f32 %v1711_v53, %v752_v26  ;;  %v855_v14 = vmax.f32 %v761_v24, 0.0 }
 0x1ba   : > { %v1392_v27 = vpop.f32.mrf.mxu1 }
 0x1bb   : > { %v853_v29 = vmax.f32 %v753_v5, 0.0  ;;  %v881_v34 = vpack.c.bf16 %v855_v14, %v854_v30  ;;  %v774_v23 = vadd.f32 %v1392_v27, %v1711_v53 }
 0x1bc   : > { %v765_v31 = vpop.f32.mrf.mxu1 }
 0x1bd   : > { %v880_v33 = vpack.c.bf16 %v853_v29, %v852_v28  ;;  %v766_v36 = vadd.f32 %v1711_v53, %v765_v31  ;;  %v858_v44 = vmax.f32 %v774_v23, 0.0 }
 0x1be   : > { %v1393_v35 = vpop.f32.mrf.mxu1 }
 0x1bf   : > { %v777_v37 = vadd.f32 %v1393_v35, %v1711_v53  ;;  %1434 = vmatprep.mubr.bf16.mxu0 %v880_v33  ;;  %v856_v42 = vmax.f32 %v766_v36, 0.0 }
 0x1c0   : > { %v768_v38 = vpop.f32.mrf.mxu1  ;;  %1435 = vmatmul.mubr.bf16.gmra.mxu0 %v881_v34 }
 0x1c1   : > { %v769_v32 = vadd.f32 %v1711_v53, %v768_v38  ;;  %v859_v39 = vmax.f32 %v777_v37, 0.0 }
 0x1c2   : > { %v1396_v40 = vpop.f32.mrf.mxu1 }
 0x1c3   : > { %v857_v43 = vmax.f32 %v769_v32, 0.0  ;;  %v883_v47 = vpack.c.bf16 %v859_v39, %v858_v44  ;;  %v790_v50 = vadd.f32 %v1396_v40, %v1711_v53  ;;  %v1748_v32 = vld [vmem:[%s1830_s6] ss:$0 sm:$0xff] }
 0x1c4   : > { %v781_v45 = vpop.f32.mrf.mxu1 }
 0x1c5   : > { %v882_v46 = vpack.c.bf16 %v857_v43, %v856_v42  ;;  %v782_v49 = vadd.f32 %v1711_v53, %v781_v45  ;;  %v862_v57 = vmax.f32 %v790_v50, 0.0 }
 0x1c6   : > { %v1397_v48 = vpop.f32.mrf.mxu1 }
 0x1c7   : > { %v793_v41 = vadd.f32 %v1397_v48, %v1711_v53  ;;  %1438 = vmatprep.mubr.bf16.mxu0 %v882_v46  ;;  %v860_v55 = vmax.f32 %v782_v49, 0.0 }
 0x1c8   : > { %v784_v1 = vpop.f32.mrf.mxu1  ;;  %1439 = vmatmul.mubr.bf16.gmra.mxu0 %v883_v47 }
 0x1c9   : > { %v785_v51 = vadd.f32 %v1711_v53, %v784_v1  ;;  %v863_v52 = vmax.f32 %v793_v41, 0.0 }
 0x1ca   : > { %v1400_v54 = vpop.f32.mrf.mxu1 }
 0x1cb   : > { %v861_v56 = vmax.f32 %v785_v51, 0.0  ;;  %v885_v60 = vpack.c.bf16 %v863_v52, %v862_v57  ;;  %v806_v0 = vadd.f32 %v1400_v54, %v1711_v53 }
 0x1cc   : > { %v797_v58 = vpop.f32.mrf.mxu1 }
 0x1cd   : > { %v884_v59 = vpack.c.bf16 %v861_v56, %v860_v55  ;;  %v798_v62 = vadd.f32 %v1711_v53, %v797_v58  ;;  %v866_v9 = vmax.f32 %v806_v0, 0.0 }
 0x1ce   : > { %v1401_v61 = vpop.f32.mrf.mxu1 }
 0x1cf   : > { %v809_v63 = vadd.f32 %v1401_v61, %v1711_v53  ;;  %1442 = vmatprep.mubr.bf16.mxu0 %v884_v59  ;;  %v864_v7 = vmax.f32 %v798_v62, 0.0 }
 0x1d0   : > { %v800_v2 = vpop.f32.mrf.mxu1  ;;  %1443 = vmatmul.mubr.bf16.gmra.mxu0 %v885_v60 }
 0x1d1   : > { %v801_v3 = vadd.f32 %v1711_v53, %v800_v2  ;;  %v867_v4 = vmax.f32 %v809_v63, 0.0 }
 0x1d2   : > { %v1404_v6 = vpop.f32.mrf.mxu1 }
 0x1d3   : > { %v865_v8 = vmax.f32 %v801_v3, 0.0  ;;  %v887_v12 = vpack.c.bf16 %v867_v4, %v866_v9  ;;  %v822_v17 = vadd.f32 %v1404_v6, %v1711_v53 }
 0x1d4   : > { %v813_v10 = vpop.f32.mrf.mxu1 }
 0x1d5   : > { %v886_v11 = vpack.c.bf16 %v865_v8, %v864_v7  ;;  %v814_v15 = vadd.f32 %v1711_v53, %v813_v10  ;;  %v870_v25 = vmax.f32 %v822_v17, 0.0 }
 0x1d6   : > { %v1405_v13 = vpop.f32.mrf.mxu1 }
 0x1d7   : > { %v825_v16 = vadd.f32 %v1405_v13, %v1711_v53  ;;  %1446 = vmatprep.mubr.bf16.mxu0 %v886_v11  ;;  %v868_v22 = vmax.f32 %v814_v15, 0.0 }
 0x1d8   : > { %v816_v18 = vpop.f32.mrf.mxu1  ;;  %1447 = vmatmul.mubr.bf16.gmra.mxu0 %v887_v12 }
 0x1d9   : > { %v817_v19 = vadd.f32 %v1711_v53, %v816_v18  ;;  %v871_v20 = vmax.f32 %v825_v16, 0.0 }
 0x1da   : > { %v1408_v21 = vpop.f32.mrf.mxu1 }
 0x1db   : > { %v869_v24 = vmax.f32 %v817_v19, 0.0  ;;  %v889_v14 = vpack.c.bf16 %v871_v20, %v870_v25  ;;  %v838_v30 = vadd.f32 %v1408_v21, %v1711_v53 }
 0x1dc   : > { %v829_v26 = vpop.f32.mrf.mxu1 }
 0x1dd   : > { %v888_v5 = vpack.c.bf16 %v869_v24, %v868_v22  ;;  %v830_v28 = vadd.f32 %v1711_v53, %v829_v26  ;;  %v874_v37 = vmax.f32 %v838_v30, 0.0 }
 0x1de   : > { %v1409_v27 = vpop.f32.mrf.mxu1 }
 0x1df   : > { %v841_v29 = vadd.f32 %v1409_v27, %v1711_v53  ;;  %1450 = vmatprep.mubr.bf16.mxu0 %v888_v5  ;;  %v872_v35 = vmax.f32 %v830_v28, 0.0 }
 0x1e0   : > { %v832_v31 = vpop.f32.mrf.mxu1  ;;  %1451 = vmatmul.mubr.bf16.gmra.mxu0 %v889_v14 }
 0x1e1   : > { %v833_v33 = vadd.f32 %v1711_v53, %v832_v31  ;;  %v875_v34 = vmax.f32 %v841_v29, 0.0 }
 0x1e3   : > { %v873_v36 = vmax.f32 %v833_v33, 0.0  ;;  %v891_v38 = vpack.c.bf16 %v875_v34, %v874_v37 }
 0x1e5   : > { %v890_v23 = vpack.c.bf16 %v873_v36, %v872_v35 }
 0x1e7   : > { %1454 = vmatprep.mubr.bf16.mxu0 %v890_v23 }
 0x1e8   : > { %1455 = vmatmul.mubr.bf16.gmra.mxu0 %v891_v38 }
 0x270   : > { %v1428_v53 = vpop.f32.mrf.mxu0 }
 0x271   : > { %v1006_v39 = vadd.f32 %v1428_v53, %v1748_v32 }
 0x272   : > { %v997_v40 = vpop.f32.mrf.mxu0 }
 0x273   : > { %1126 = vst [vmem:[%s1755_s12 + $0x10] sm:$0xff] %v1006_v39  ;;  %v998_v42 = vadd.f32 %v1748_v32, %v997_v40 }
 0x274   : > { %v1429_v43 = vpop.f32.mrf.mxu0 }
 0x275   : > { %1124 = vst [vmem:[%s1755_s12] sm:$0xff] %v998_v42  ;;  %v1009_v44 = vadd.f32 %v1429_v43, %v1748_v32 }
 0x276   : > { %v1000_v45 = vpop.f32.mrf.mxu0 }
 0x277   : > { %1127 = vst [vmem:[%s1755_s12 + $0x18] sm:$0xff] %v1009_v44  ;;  %v1001_v46 = vadd.f32 %v1748_v32, %v1000_v45 }
 0x278   : > { %v1432_v47 = vpop.f32.mrf.mxu0 }
 0x279   : > { %1125 = vst [vmem:[%s1755_s12 + $0x8] sm:$0xff] %v1001_v46  ;;  %v1022_v48 = vadd.f32 %v1432_v47, %v1748_v32 }
 0x27a   : > { %v1013_v49 = vpop.f32.mrf.mxu0 }
 0x27b   : > { %1130 = vst [vmem:[%s1755_s12 + $0x30] sm:$0xff] %v1022_v48  ;;  %v1014_v41 = vadd.f32 %v1748_v32, %v1013_v49 }
 0x27c   : > { %v1433_v50 = vpop.f32.mrf.mxu0 }
 0x27d   : > { %1128 = vst [vmem:[%s1755_s12 + $0x20] sm:$0xff] %v1014_v41  ;;  %v1025_v1 = vadd.f32 %v1433_v50, %v1748_v32 }
 0x27e   : > { %v1016_v51 = vpop.f32.mrf.mxu0 }
 0x27f   : > { %1131 = vst [vmem:[%s1755_s12 + $0x38] sm:$0xff] %v1025_v1  ;;  %v1017_v52 = vadd.f32 %v1748_v32, %v1016_v51 }
 0x280   : > { %v1436_v54 = vpop.f32.mrf.mxu0 }
 0x281   : > { %1129 = vst [vmem:[%s1755_s12 + $0x28] sm:$0xff] %v1017_v52  ;;  %v1038_v55 = vadd.f32 %v1436_v54, %v1748_v32 }
 0x282   : > { %v1029_v56 = vpop.f32.mrf.mxu0 }
 0x283   : > { %1134 = vst [vmem:[%s1755_s12 + $0x50] sm:$0xff] %v1038_v55  ;;  %v1030_v57 = vadd.f32 %v1748_v32, %v1029_v56 }
 0x284   : > { %v1437_v58 = vpop.f32.mrf.mxu0 }
 0x285   : > { %1132 = vst [vmem:[%s1755_s12 + $0x40] sm:$0xff] %v1030_v57  ;;  %v1041_v59 = vadd.f32 %v1437_v58, %v1748_v32 }
 0x286   : > { %v1032_v60 = vpop.f32.mrf.mxu0 }
 0x287   : > { %1135 = vst [vmem:[%s1755_s12 + $0x58] sm:$0xff] %v1041_v59  ;;  %v1033_v61 = vadd.f32 %v1748_v32, %v1032_v60 }
 0x288   : > { %v1440_v62 = vpop.f32.mrf.mxu0 }
 0x289   : > { %1133 = vst [vmem:[%s1755_s12 + $0x48] sm:$0xff] %v1033_v61  ;;  %v1054_v63 = vadd.f32 %v1440_v62, %v1748_v32 }
 0x28a   : > { %v1045_v0 = vpop.f32.mrf.mxu0 }
 0x28b   : > { %1138 = vst [vmem:[%s1755_s12 + $0x70] sm:$0xff] %v1054_v63  ;;  %v1046_v2 = vadd.f32 %v1748_v32, %v1045_v0 }
 0x28c   : > { %v1441_v3 = vpop.f32.mrf.mxu0 }
 0x28d   : > { %1136 = vst [vmem:[%s1755_s12 + $0x60] sm:$0xff] %v1046_v2  ;;  %v1057_v4 = vadd.f32 %v1441_v3, %v1748_v32 }
 0x28e   : > { %v1048_v6 = vpop.f32.mrf.mxu0 }
 0x28f   : > { %1139 = vst [vmem:[%s1755_s12 + $0x78] sm:$0xff] %v1057_v4  ;;  %v1049_v7 = vadd.f32 %v1748_v32, %v1048_v6 }
 0x290   : > { %v1444_v8 = vpop.f32.mrf.mxu0 }
 0x291   : > { %1137 = vst [vmem:[%s1755_s12 + $0x68] sm:$0xff] %v1049_v7  ;;  %v1070_v9 = vadd.f32 %v1444_v8, %v1748_v32 }
 0x292   : > { %v1061_v10 = vpop.f32.mrf.mxu0 }
 0x293   : > { %1142 = vst [vmem:[%s1755_s12 + $0x90] sm:$0xff] %v1070_v9  ;;  %v1062_v11 = vadd.f32 %v1748_v32, %v1061_v10 }
 0x294   : > { %v1445_v12 = vpop.f32.mrf.mxu0 }
 0x295   : > { %1140 = vst [vmem:[%s1755_s12 + $0x80] sm:$0xff] %v1062_v11  ;;  %v1073_v13 = vadd.f32 %v1445_v12, %v1748_v32 }
 0x296   : > { %v1064_v15 = vpop.f32.mrf.mxu0 }
 0x297   : > { %1143 = vst [vmem:[%s1755_s12 + $0x98] sm:$0xff] %v1073_v13  ;;  %v1065_v16 = vadd.f32 %v1748_v32, %v1064_v15 }
 0x298   : > { %v1448_v17 = vpop.f32.mrf.mxu0 }
 0x299   : > { %1141 = vst [vmem:[%s1755_s12 + $0x88] sm:$0xff] %v1065_v16  ;;  %v1086_v18 = vadd.f32 %v1448_v17, %v1748_v32 }
 0x29a   : > { %v1077_v19 = vpop.f32.mrf.mxu0 }
 0x29b   : > { %1146 = vst [vmem:[%s1755_s12 + $0xb0] sm:$0xff] %v1086_v18  ;;  %v1078_v20 = vadd.f32 %v1748_v32, %v1077_v19 }
 0x29c   : > { %v1449_v21 = vpop.f32.mrf.mxu0 }
 0x29d   : > { %1144 = vst [vmem:[%s1755_s12 + $0xa0] sm:$0xff] %v1078_v20  ;;  %v1089_v22 = vadd.f32 %v1449_v21, %v1748_v32 }
 0x29e   : > { %v1080_v24 = vpop.f32.mrf.mxu0 }
 0x29f   : > { %1147 = vst [vmem:[%s1755_s12 + $0xb8] sm:$0xff] %v1089_v22  ;;  %v1081_v25 = vadd.f32 %v1748_v32, %v1080_v24 }
 0x2a0   : > { %v1452_v26 = vpop.f32.mrf.mxu0 }
 0x2a1   : > { %1145 = vst [vmem:[%s1755_s12 + $0xa8] sm:$0xff] %v1081_v25  ;;  %v1102_v5 = vadd.f32 %v1452_v26, %v1748_v32 }
 0x2a2   : > { %v1093_v14 = vpop.f32.mrf.mxu0 }
 0x2a3   : > { %1150 = vst [vmem:[%s1755_s12 + $0xd0] sm:$0xff] %v1102_v5  ;;  %v1094_v27 = vadd.f32 %v1748_v32, %v1093_v14 }
 0x2a4   : > { %v1453_v28 = vpop.f32.mrf.mxu0 }
 0x2a5   : > { %1148 = vst [vmem:[%s1755_s12 + $0xc0] sm:$0xff] %v1094_v27  ;;  %v1105_v29 = vadd.f32 %v1453_v28, %v1748_v32 }
 0x2a6   : > { %v1096_v30 = vpop.f32.mrf.mxu0 }
 0x2a7   : > { %1151 = vst [vmem:[%s1755_s12 + $0xd8] sm:$0xff] %v1105_v29  ;;  %v1097_v31 = vadd.f32 %v1748_v32, %v1096_v30 }
 0x2a8   : > { %v1456_v33 = vpop.f32.mrf.mxu0 }
 0x2a9   : > { %1149 = vst [vmem:[%s1755_s12 + $0xc8] sm:$0xff] %v1097_v31  ;;  %v1118_v34 = vadd.f32 %v1456_v33, %v1748_v32 }
 0x2aa   : > { %v1109_v35 = vpop.f32.mrf.mxu0 }
 0x2ab   : > { %1154 = vst [vmem:[%s1755_s12 + $0xf0] sm:$0xff] %v1118_v34  ;;  %v1110_v36 = vadd.f32 %v1748_v32, %v1109_v35 }
 0x2ac   : > { %v1457_v37 = vpop.f32.mrf.mxu0 }
 0x2ad   : > { %1152 = vst [vmem:[%s1755_s12 + $0xe0] sm:$0xff] %v1110_v36  ;;  %v1121_v23 = vadd.f32 %v1457_v37, %v1748_v32 }
 0x2ae   : > { %v1112_v38 = vpop.f32.mrf.mxu0 }
 0x2af   : > { %1155 = vst [vmem:[%s1755_s12 + $0xf8] sm:$0xff] %v1121_v23  ;;  %v1113_v53 = vadd.f32 %v1748_v32, %v1112_v38 }
 0x2b1   : > { %1153 = vst [vmem:[%s1755_s12 + $0xe8] sm:$0xff] %v1113_v53 }
 0x2b2 PF: > { %s17_s24 = sadd.s32 1, %s1494_s24  }
 0x2b3   : > { %p14_p4 = scmp.ge.s32.totalorder %s17_s24, 4  }
 0x2b5   :  { %16 = sbr.rel (!%p14_p4) target bundleno = 1 (0x1), region = 78 }

</bundles_post_ra>
